<compile_context>
chip_gen: v7x
topology: tpu7x:2x2x1
jax: 0.10.0
libtpu: 0.0.40
codegen_flags: <defaults>
</compile_context>

<pallas_src>
import numpy as np
import jax
import jax.numpy as jnp
from jax.experimental import pallas as pl
from jax.experimental.pallas import tpu as pltpu

# SMEM params layout (f32[12]), compound constants pre-packed in the wrapper.
_MP, _MC, _B1, _B2, _DT, _HALF_DT, _G, _GEAR, _VLIM, _MCMP, _MCMP_G, _MCMP_B1 = range(12)


def _cartpole_kernel(params_ref, state_ref, action_ref, out_ref):
    mp = params_ref[_MP]
    mc = params_ref[_MC]
    b1 = params_ref[_B1]
    b2 = params_ref[_B2]
    dt = params_ref[_DT]
    half_dt = params_ref[_HALF_DT]
    g = params_ref[_G]
    gear = params_ref[_GEAR]
    vlim = params_ref[_VLIM]
    mcmp_g = params_ref[_MCMP_G]    # (mc + mp) * g
    mcmp_b1 = params_ref[_MCMP_B1]  # (mc + mp) * b1

    state = state_ref[...]                                  # (6, TB), batch on lanes
    force = gear * jnp.clip(action_ref[...], -1.0, 1.0)     # (1, TB)

    x_rob = state[0:1, :]
    x_rob_dot = state[1:2, :]
    xmass = state[2:3, :]
    ymass = state[3:4, :]
    xmass_dot = state[4:5, :]
    ymass_dot = state[5:6, :]

    # theta = atan2(dx, dy) is never needed explicitly:
    #   sin(theta) = dx/l, cos(theta) = dy/l, l*cos(theta) = dy, l*sin(theta) = dx.
    dx = xmass - x_rob                 # = l * sin(theta)
    dy = -ymass                        # = l * cos(theta)   (y_cart == 0)
    l = jnp.sqrt(dx * dx + dy * dy)
    inv_l = pl.reciprocal(l, approx=False)
    sintheta = dx * inv_l
    costheta = dy * inv_l

    # est_x = (xmass_dot - x_rob_dot)/(l*cos); est_y = (ymass_dot - 0)/(l*sin)
    theta_dot = 0.5 * ((xmass_dot - x_rob_dot) / dy + ymass_dot / dx)
    td2 = theta_dot * theta_dot

    tmp = l * (mc + mp * sintheta * sintheta)
    inv_tmp = pl.reciprocal(tmp, approx=False)   # one reciprocal shared by both accels

    x_rob_acc = (force * l
                 + mp * l * sintheta * (l * td2 + g * costheta)
                 + costheta * b1 * theta_dot
                 - l * b2 * x_rob_dot) * inv_tmp
    thetaacc = (-force * costheta
                - mp * l * td2 * sintheta * costheta
                - mcmp_g * sintheta
                + b2 * x_rob_dot * costheta
                - mcmp_b1 * theta_dot) * inv_tmp

    # propagate(var, var_dot) = var + var_dot * dt
    new_x_rob_dot = x_rob_dot + x_rob_acc * dt
    new_theta_dot = theta_dot + thetaacc * dt
    new_x_rob = x_rob + half_dt * (x_rob_dot + new_x_rob_dot)

    # new_theta = theta + d_theta; only sin/cos(new_theta) are needed, obtained
    # via angle addition so atan2/sin/cos of theta are never evaluated.
    d_theta = half_dt * (theta_dot + new_theta_dot)
    sin_d = jnp.sin(d_theta)
    cos_d = jnp.cos(d_theta)
    new_sintheta = sintheta * cos_d + costheta * sin_d
    new_costheta = costheta * cos_d - sintheta * sin_d

    new_xmass = new_x_rob + l * new_sintheta
    new_ymass = -l * new_costheta

    # NOTE: faithfully reproduces the torch module, which clamps with
    # min=vlim AND max=vlim (both velocities become exactly vlim).
    new_theta_dot = jnp.clip(new_theta_dot, vlim, vlim)
    new_x_rob_dot = jnp.clip(new_x_rob_dot, vlim, vlim)

    new_dot_xmass = l * new_costheta * new_theta_dot
    new_dot_ymass = l * new_sintheta * new_theta_dot

    # Single unmasked full-tile store (6, TB).
    out_ref[...] = jnp.concatenate(
        (new_x_rob, new_x_rob_dot, new_xmass, new_ymass,
         new_dot_xmass, new_dot_ymass), axis=0)


def cartpole_forward(state, action,
                     pole_mass=1.0, rob_mass=1.0, angular_damping=0.1,
                     linear_damping=0.2, dt=0.05, g=9.81, gear=40.0, vlim=20.0,
                     tile_b=512):
    """state: (B, 6) f32; action: (B, 1) f32 -> next_state (B, 6) f32."""
    state = jnp.asarray(state, jnp.float32)
    action = jnp.asarray(action, jnp.float32)
    B = state.shape[0]

    # Batch maps to the 128-lane axis: pad to a lane multiple and tile.
    if B <= tile_b:
        b_pad = pl.cdiv(B, 128) * 128
        tile = b_pad
    else:
        tile = tile_b
        b_pad = pl.cdiv(B, tile) * tile
    grid = (b_pad // tile,)

    # Feature-major layout: features on sublanes, batch on lanes.  Padded lanes
    # may compute inf/nan (dx=dy=0) but feed no cross-lane op and are sliced
    # off below.
    state_t = jnp.pad(state, ((0, b_pad - B), (0, 0))).T       # (6, b_pad)
    action_t = jnp.pad(action, ((0, b_pad - B), (0, 0))).T     # (1, b_pad)

    mp = float(pole_mass)
    mc = float(rob_mass)
    b1 = float(angular_damping)
    b2 = float(linear_damping)
    params = jnp.array(
        [mp, mc, b1, b2, dt, 0.5 * dt, g, gear, vlim,
         mc + mp, (mc + mp) * g, (mc + mp) * b1],
        dtype=jnp.float32)

    out_t = pl.pallas_call(
        _cartpole_kernel,
        out_shape=jax.ShapeDtypeStruct((6, b_pad), jnp.float32),
        grid=grid,
        in_specs=[
            pl.BlockSpec(memory_space=pltpu.SMEM),             # scalar params
            pl.BlockSpec((6, tile), lambda i: (0, i)),          # state tile
            pl.BlockSpec((1, tile), lambda i: (0, i)),          # action tile
        ],
        out_specs=pl.BlockSpec((6, tile), lambda i: (0, i)),
        compiler_params=pltpu.CompilerParams(
            dimension_semantics=("parallel",)),
    )(params, state_t, action_t)

    return out_t.T[:B]

# TODO(synk): if this is called per step of a rollout, fuse T steps into one
# pallas_call with the state held in VMEM scratch to avoid per-step HBM
# round-trips and launch overhead.


def _reference_forward(state, action,
                       pole_mass=1.0, rob_mass=1.0, angular_damping=0.1,
                       linear_damping=0.2, dt=0.05, g=9.81, gear=40.0, vlim=20.0):
    """Pure-numpy reference mirroring the torch module for verification."""
    x_rob = state[:, 0:1]
    x_rob_dot = state[:, 1:2]
    xmass = state[:, 2:3]
    ymass = state[:, 3:4]
    xmass_dot = state[:, 4:5]
    ymass_dot = state[:, 5:6]
    dx = xmass - x_rob
    dy = 0.0 - ymass
    theta = np.arctan2(dx, dy)
    s, c = np.sin(theta), np.cos(theta)
    l = np.sqrt(dx * dx + dy * dy)
    theta_dot = ((xmass_dot - x_rob_dot) / (l * c) + (ymass_dot - 0.0) / (l * s)) * 0.5
    mp, mc, b1, b2 = pole_mass, rob_mass, angular_damping, linear_damping
    force = gear * np.clip(action, -1.0, 1.0)
    tmp = l * (mc + mp * s * s)
    x_rob_acc = (force * l + mp * l * s * (l * theta_dot ** 2 + g * c)
                 + c * b1 * theta_dot - l * b2 * x_rob_dot) / tmp
    thetaacc = (-force * c - mp * l * theta_dot ** 2 * s * c
                - (mc + mp) * g * s + b2 * x_rob_dot * c
                - (mc + mp) * b1 * theta_dot) / tmp
    new_x_rob_dot = x_rob_dot + x_rob_acc * dt
    new_theta_dot = theta_dot + thetaacc * dt
    new_x_rob = x_rob + 0.5 * (x_rob_dot + new_x_rob_dot) * dt
    new_theta = theta + 0.5 * (theta_dot + new_theta_dot) * dt
    ns, nc = np.sin(new_theta), np.cos(new_theta)
    new_xmass = new_x_rob + l * ns
    new_ymass = -l * nc
    new_theta_dot = np.clip(new_theta_dot, vlim, vlim)
    new_x_rob_dot = np.clip(new_x_rob_dot, vlim, vlim)
    new_dot_xmass = l * nc * new_theta_dot
    new_dot_ymass = l * ns * new_theta_dot
    return np.concatenate((new_x_rob, new_x_rob_dot, new_xmass, new_ymass,
                           new_dot_xmass, new_dot_ymass), axis=1)


def _make_inputs(B, key):
    k_state, k_action = jax.random.split(key)
    x_rob = jax.random.uniform(k_state, (B, 1), minval=-1.0, maxval=1.0)
    theta0 = jax.random.uniform(jax.random.fold_in(k_state, 1), (B, 1),
                                minval=0.2, maxval=1.2)
    length = 1.0
    xmass = x_rob + length * jnp.sin(theta0)
    ymass = -length * jnp.cos(theta0)
    x_rob_dot = jax.random.uniform(jax.random.fold_in(k_state, 2), (B, 1),
                                   minval=-0.5, maxval=0.5)
    theta_dot0 = jax.random.uniform(jax.random.fold_in(k_state, 3), (B, 1),
                                    minval=-0.5, maxval=0.5)
    xmass_dot = x_rob_dot + length * jnp.cos(theta0) * theta_dot0
    ymass_dot = length * jnp.sin(theta0) * theta_dot0
    state = jnp.concatenate(
        [x_rob, x_rob_dot, xmass, ymass, xmass_dot, ymass_dot], axis=1
    ).astype(jnp.float32)
    action = jax.random.uniform(k_action, (B, 1),
                                minval=-2.0, maxval=2.0).astype(jnp.float32)
    return state, action


if __name__ == "__main__":
    key = jax.random.PRNGKey(0)
    # B=8: small single-tile case (pads to 128 lanes).
    # B=600: exercises lane padding + a 2-step parallel grid (tile=512).
    for B in (8, 600):
        state, action = _make_inputs(B, jax.random.fold_in(key, B))
        out = jax.block_until_ready(cartpole_forward(state, action))
        ref = _reference_forward(np.asarray(state, dtype=np.float64),
                                 np.asarray(action, dtype=np.float64))
        np.testing.assert_allclose(np.asarray(out), ref, rtol=1e-4, atol=1e-4)
    print("KERNEL_OK")
</pallas_src>

<mosaic_0001>
module attributes {stable_mosaic.version = 11 : i64} {
  func.func @_cartpole_kernel(%arg0: i32, %arg1: memref<12xf32, #tpu.memory_space<smem>>, %arg2: memref<6x128xf32, #tpu.memory_space<vmem>>, %arg3: memref<1x128xf32, #tpu.memory_space<vmem>>, %arg4: memref<6x128xf32, #tpu.memory_space<vmem>>) attributes {dimension_semantics = [#tpu.dimension_semantics<parallel>], iteration_bounds = array<i64: 1>, scalar_prefetch = 0 : i64, scratch_operands = 0 : i64, tpu.core_type = #tpu.core_type<tc>, window_params = [{transform_indices = @transform_0, window_bounds = array<i64: 12>}, {transform_indices = @transform_1, window_bounds = array<i64: 6, 128>}, {transform_indices = @transform_2, window_bounds = array<i64: 1, 128>}, {transform_indices = @transform_3, window_bounds = array<i64: 6, 128>}]} {
    %c0 = arith.constant 0 : index
    %0 = memref.load %arg1[%c0] : memref<12xf32, #tpu.memory_space<smem>>
    %c1 = arith.constant 1 : index
    %1 = memref.load %arg1[%c1] : memref<12xf32, #tpu.memory_space<smem>>
    %c2 = arith.constant 2 : index
    %2 = memref.load %arg1[%c2] : memref<12xf32, #tpu.memory_space<smem>>
    %c3 = arith.constant 3 : index
    %3 = memref.load %arg1[%c3] : memref<12xf32, #tpu.memory_space<smem>>
    %c4 = arith.constant 4 : index
    %4 = memref.load %arg1[%c4] : memref<12xf32, #tpu.memory_space<smem>>
    %c5 = arith.constant 5 : index
    %5 = memref.load %arg1[%c5] : memref<12xf32, #tpu.memory_space<smem>>
    %c6 = arith.constant 6 : index
    %6 = memref.load %arg1[%c6] : memref<12xf32, #tpu.memory_space<smem>>
    %c7 = arith.constant 7 : index
    %7 = memref.load %arg1[%c7] : memref<12xf32, #tpu.memory_space<smem>>
    %c8 = arith.constant 8 : index
    %8 = memref.load %arg1[%c8] : memref<12xf32, #tpu.memory_space<smem>>
    %c10 = arith.constant 10 : index
    %9 = memref.load %arg1[%c10] : memref<12xf32, #tpu.memory_space<smem>>
    %c11 = arith.constant 11 : index
    %10 = memref.load %arg1[%c11] : memref<12xf32, #tpu.memory_space<smem>>
    %c0_0 = arith.constant 0 : index
    %c0_1 = arith.constant 0 : index
    %11 = vector.load %arg2[%c0_0, %c0_1] : memref<6x128xf32, #tpu.memory_space<vmem>>, vector<6x128xf32>
    %c0_2 = arith.constant 0 : index
    %c0_3 = arith.constant 0 : index
    %12 = vector.load %arg3[%c0_2, %c0_3] : memref<1x128xf32, #tpu.memory_space<vmem>>, vector<1x128xf32>
    %cst = arith.constant -1.000000e+00 : f32
    %cst_4 = arith.constant 1.000000e+00 : f32
    %13 = vector.broadcast %cst : f32 to vector<1x128xf32>
    %14 = arith.maximumf %13, %12 : vector<1x128xf32>
    %15 = vector.broadcast %cst_4 : f32 to vector<1x128xf32>
    %16 = arith.minimumf %15, %14 : vector<1x128xf32>
    %17 = vector.broadcast %7 : f32 to vector<1x128xf32>
    %18 = arith.mulf %17, %16 : vector<1x128xf32>
    %19 = vector.extract_strided_slice %11 {offsets = [0, 0], sizes = [1, 128], strides = [1, 1]} : vector<6x128xf32> to vector<1x128xf32>
    %20 = vector.extract_strided_slice %11 {offsets = [1, 0], sizes = [1, 128], strides = [1, 1]} : vector<6x128xf32> to vector<1x128xf32>
    %21 = vector.extract_strided_slice %11 {offsets = [2, 0], sizes = [1, 128], strides = [1, 1]} : vector<6x128xf32> to vector<1x128xf32>
    %22 = vector.extract_strided_slice %11 {offsets = [3, 0], sizes = [1, 128], strides = [1, 1]} : vector<6x128xf32> to vector<1x128xf32>
    %23 = vector.extract_strided_slice %11 {offsets = [4, 0], sizes = [1, 128], strides = [1, 1]} : vector<6x128xf32> to vector<1x128xf32>
    %24 = vector.extract_strided_slice %11 {offsets = [5, 0], sizes = [1, 128], strides = [1, 1]} : vector<6x128xf32> to vector<1x128xf32>
    %25 = arith.subf %21, %19 : vector<1x128xf32>
    %cst_5 = arith.constant 0.000000e+00 : f32
    %26 = vector.broadcast %cst_5 : f32 to vector<1x128xf32>
    %27 = arith.subf %26, %22 : vector<1x128xf32>
    %28 = arith.mulf %25, %25 : vector<1x128xf32>
    %29 = arith.mulf %27, %27 : vector<1x128xf32>
    %30 = arith.addf %28, %29 : vector<1x128xf32>
    %31 = math.sqrt %30 : vector<1x128xf32>
    %32 = tpu.reciprocal %31 : vector<1x128xf32> -> vector<1x128xf32>
    %33 = arith.mulf %25, %32 : vector<1x128xf32>
    %34 = arith.mulf %27, %32 : vector<1x128xf32>
    %35 = arith.subf %23, %20 : vector<1x128xf32>
    %36 = arith.divf %35, %27 : vector<1x128xf32>
    %37 = arith.divf %24, %25 : vector<1x128xf32>
    %38 = arith.addf %36, %37 : vector<1x128xf32>
    %cst_6 = arith.constant 5.000000e-01 : f32
    %39 = vector.broadcast %cst_6 : f32 to vector<1x128xf32>
    %40 = arith.mulf %39, %38 : vector<1x128xf32>
    %41 = arith.mulf %40, %40 : vector<1x128xf32>
    %42 = vector.broadcast %0 : f32 to vector<1x128xf32>
    %43 = arith.mulf %42, %33 : vector<1x128xf32>
    %44 = arith.mulf %43, %33 : vector<1x128xf32>
    %45 = vector.broadcast %1 : f32 to vector<1x128xf32>
    %46 = arith.addf %45, %44 : vector<1x128xf32>
    %47 = arith.mulf %31, %46 : vector<1x128xf32>
    %48 = tpu.reciprocal %47 : vector<1x128xf32> -> vector<1x128xf32>
    %49 = arith.mulf %18, %31 : vector<1x128xf32>
    %50 = vector.broadcast %0 : f32 to vector<1x128xf32>
    %51 = arith.mulf %50, %31 : vector<1x128xf32>
    %52 = arith.mulf %51, %33 : vector<1x128xf32>
    %53 = arith.mulf %31, %41 : vector<1x128xf32>
    %54 = vector.broadcast %6 : f32 to vector<1x128xf32>
    %55 = arith.mulf %54, %34 : vector<1x128xf32>
    %56 = arith.addf %53, %55 : vector<1x128xf32>
    %57 = arith.mulf %52, %56 : vector<1x128xf32>
    %58 = arith.addf %49, %57 : vector<1x128xf32>
    %59 = vector.broadcast %2 : f32 to vector<1x128xf32>
    %60 = arith.mulf %34, %59 : vector<1x128xf32>
    %61 = arith.mulf %60, %40 : vector<1x128xf32>
    %62 = arith.addf %58, %61 : vector<1x128xf32>
    %63 = vector.broadcast %3 : f32 to vector<1x128xf32>
    %64 = arith.mulf %31, %63 : vector<1x128xf32>
    %65 = arith.mulf %64, %20 : vector<1x128xf32>
    %66 = arith.subf %62, %65 : vector<1x128xf32>
    %67 = arith.mulf %66, %48 : vector<1x128xf32>
    %cst_7 = arith.constant 0.000000e+00 : f32
    %68 = vector.broadcast %cst_7 : f32 to vector<1x128xf32>
    %69 = arith.subf %68, %18 : vector<1x128xf32>
    %70 = arith.mulf %69, %34 : vector<1x128xf32>
    %71 = vector.broadcast %0 : f32 to vector<1x128xf32>
    %72 = arith.mulf %71, %31 : vector<1x128xf32>
    %73 = arith.mulf %72, %41 : vector<1x128xf32>
    %74 = arith.mulf %73, %33 : vector<1x128xf32>
    %75 = arith.mulf %74, %34 : vector<1x128xf32>
    %76 = arith.subf %70, %75 : vector<1x128xf32>
    %77 = vector.broadcast %9 : f32 to vector<1x128xf32>
    %78 = arith.mulf %77, %33 : vector<1x128xf32>
    %79 = arith.subf %76, %78 : vector<1x128xf32>
    %80 = vector.broadcast %3 : f32 to vector<1x128xf32>
    %81 = arith.mulf %80, %20 : vector<1x128xf32>
    %82 = arith.mulf %81, %34 : vector<1x128xf32>
    %83 = arith.addf %79, %82 : vector<1x128xf32>
    %84 = vector.broadcast %10 : f32 to vector<1x128xf32>
    %85 = arith.mulf %84, %40 : vector<1x128xf32>
    %86 = arith.subf %83, %85 : vector<1x128xf32>
    %87 = arith.mulf %86, %48 : vector<1x128xf32>
    %88 = vector.broadcast %4 : f32 to vector<1x128xf32>
    %89 = arith.mulf %67, %88 : vector<1x128xf32>
    %90 = arith.addf %20, %89 : vector<1x128xf32>
    %91 = vector.broadcast %4 : f32 to vector<1x128xf32>
    %92 = arith.mulf %87, %91 : vector<1x128xf32>
    %93 = arith.addf %40, %92 : vector<1x128xf32>
    %94 = arith.addf %20, %90 : vector<1x128xf32>
    %95 = vector.broadcast %5 : f32 to vector<1x128xf32>
    %96 = arith.mulf %95, %94 : vector<1x128xf32>
    %97 = arith.addf %19, %96 : vector<1x128xf32>
    %98 = arith.addf %40, %93 : vector<1x128xf32>
    %99 = vector.broadcast %5 : f32 to vector<1x128xf32>
    %100 = arith.mulf %99, %98 : vector<1x128xf32>
    %101 = math.sin %100 : vector<1x128xf32>
    %102 = math.cos %100 : vector<1x128xf32>
    %103 = arith.mulf %33, %102 : vector<1x128xf32>
    %104 = arith.mulf %34, %101 : vector<1x128xf32>
    %105 = arith.addf %103, %104 : vector<1x128xf32>
    %106 = arith.mulf %34, %102 : vector<1x128xf32>
    %107 = arith.mulf %33, %101 : vector<1x128xf32>
    %108 = arith.subf %106, %107 : vector<1x128xf32>
    %109 = arith.mulf %31, %105 : vector<1x128xf32>
    %110 = arith.addf %97, %109 : vector<1x128xf32>
    %cst_8 = arith.constant 0.000000e+00 : f32
    %111 = vector.broadcast %cst_8 : f32 to vector<1x128xf32>
    %112 = arith.subf %111, %31 : vector<1x128xf32>
    %113 = arith.mulf %112, %108 : vector<1x128xf32>
    %114 = vector.broadcast %8 : f32 to vector<1x128xf32>
    %115 = arith.maximumf %114, %93 : vector<1x128xf32>
    %116 = vector.broadcast %8 : f32 to vector<1x128xf32>
    %117 = arith.minimumf %116, %115 : vector<1x128xf32>
    %118 = vector.broadcast %8 : f32 to vector<1x128xf32>
    %119 = arith.maximumf %118, %90 : vector<1x128xf32>
    %120 = vector.broadcast %8 : f32 to vector<1x128xf32>
    %121 = arith.minimumf %120, %119 : vector<1x128xf32>
    %122 = arith.mulf %31, %108 : vector<1x128xf32>
    %123 = arith.mulf %122, %117 : vector<1x128xf32>
    %124 = arith.mulf %31, %105 : vector<1x128xf32>
    %125 = arith.mulf %124, %117 : vector<1x128xf32>
    %126 = tpu.concatenate %97, %121, %110, %113, %123, %125 in 0 : vector<1x128xf32>, vector<1x128xf32>, vector<1x128xf32>, vector<1x128xf32>, vector<1x128xf32>, vector<1x128xf32> -> vector<6x128xf32>
    %c0_9 = arith.constant 0 : index
    %c0_10 = arith.constant 0 : index
    %127 = vector.load %arg4[%c0_9, %c0_10] : memref<6x128xf32, #tpu.memory_space<vmem>>, vector<6x128xf32>
    tpu.vector_store %arg4[%c0_9, %c0_10], %126 {strides = array<i32>} : memref<6x128xf32, #tpu.memory_space<vmem>>, vector<6x128xf32>,
    return
  }
  func.func @transform_0(%arg0: i32) -> i32 {
    %c0_i32 = arith.constant 0 : i32
    %c0_i32_0 = arith.constant 0 : i32
    return %c0_i32 : i32
  }
  func.func @transform_1(%arg0: i32) -> (i32, i32) {
    %c0_i32 = arith.constant 0 : i32
    %c0_i32_0 = arith.constant 0 : i32
    return %c0_i32, %arg0 : i32, i32
  }
  func.func @transform_2(%arg0: i32) -> (i32, i32) {
    %c0_i32 = arith.constant 0 : i32
    %c0_i32_0 = arith.constant 0 : i32
    return %c0_i32, %arg0 : i32, i32
  }
  func.func @transform_3(%arg0: i32) -> (i32, i32) {
    %c0_i32 = arith.constant 0 : i32
    %c0_i32_0 = arith.constant 0 : i32
    return %c0_i32, %arg0 : i32, i32
  }
}

</mosaic_0001>

<bundles_post_ra>
// kernel: tpu_custom_call.1
= control target key start
LH: loop header
LB: loop body
LE: loop exit
PB: predicated region body
PF: predicated region fallthrough
CT: control target
= control target key end

     0   :  { %8 = vsyncpa [#allocation5], 0  ;;  %s959_s0 = inlined_call_operand.hbm [shape: f32[12], index: 0, kind: input, shape index: {}]   ;;  %s960_s1 = inlined_call_operand.hbm [shape: f32[6,128], index: 1, kind: input, shape index: {}]   ;;  %s961_s2 = inlined_call_operand.vmem [shape: f32[1,128], index: 2, kind: input, shape index: {}]   ;;  %s962_s3 = inlined_call_operand.hbm [shape: f32[6,128], index: 3, kind: output, shape index: {}]  }
   0x1   :  { %9 = vsyncpa [#allocation3], 0 }
   0x2   :  { %10 = vsyncpa [#allocation4], 0  ;;  %s688_s14 = scalar_lea.hbm %s959_s0, 16 }
   0x3   :  { %p689_p0 = scmp.ne.s32.totalorder %s959_s0, %s688_s14  ;;  %p692_p1 = scmp.lt.u32.totalorder %s688_s14, %s959_s0 }
   0x5   :  { %p694_p2 = pnand %p692_p1, %p689_p0 }
   0x7   :  { %697 = shalt.err (!%p694_p2)
}
   0x8   :  { %s748_s19 = smov [#allocation2]   ;;  %s749_s22 = smov [#allocation6]  }
   0x9   :  { %18 = dma.hbm_to_smem %s959_s0, 16, %s748_s19, [#allocation5]  }
   0xa   :  { %s25_s23 = sshll.u32 %s749_s22, 4  ;;  %s698_s26 = scalar_lea.hbm %s960_s1, 128  ;;  %s26_s23 = int_to_ptr.vmem [resolvable:$true] %s25_s23 }
   0xb   :  { %p699_p3 = scmp.ne.s32.totalorder %s960_s1, %s698_s26  ;;  %p702_p4 = scmp.lt.u32.totalorder %s698_s26, %s960_s1 }
   0xd   :  { %p704_p5 = pnand %p702_p4, %p699_p3 }
   0xf   :  { %707 = shalt.err (!%p704_p5)
}
  0x10   :  { %s708_s4 = scalar_lea.vmem %s26_s23, 128  ;;  %p713_p7 = scmp.lt.s32.totalorder %s26_s23, %s26_s23 }
  0x11   :  { %p709_p6 = scmp.ne.s32.totalorder %s26_s23, %s708_s4  ;;  %p714_p8 = scmp.lt.s32.totalorder %s708_s4, %s708_s4 }
  0x13   :  { %p715_p9 = por %p714_p8, %p713_p7 }
  0x15   :  { %p716_p10 = pnand %p715_p9, %p709_p6 }
  0x17   :  { %719 = shalt.err (!%p716_p10)
}
  0x18   :  { %28 = dma.hbm_to_vmem [thread:$0]  %s960_s1, 128, %s26_s23, [#allocation3]  }
  0x19   :  { %742 = dma.done.wait [#allocation5], 16  }
  0x1a   :  { %743 = vsyncadd [#allocation5], 4294967280 }
  0x1b   :  { %744 = dma.done.wait [#allocation3], 128  }
  0x1c   :  { %745 = vsyncadd [#allocation3], 4294967168 }
  0x1d   :  { %37 = sfence }
  0x1e   :  { %v802_v0 = vld [vmem:[#allocation6] sm:$0x3f]  ;;  %v750_v12 = vmov 1966171168   ;;  %v109_v14 = vlaneseq  ;;  %s814_s1 = sld [smem:[#allocation2 + $0x3]]  ;;  %s816_s6 = sld [smem:[#allocation2 + $0x7]] }
  0x1f   :  { %v56_v1 = vrot.slane %v802_v0, 6  ;;  %v806_v2 = vsub.f32 0.0, %v802_v0  ;;  %v79_v10 = vrot.slane %v802_v0, 5  ;;  %v107_v13 = vunpack.c.l.s4 %v750_v12  ;;  %s821_s7 = sld [smem:[#allocation2]]  ;;  %v50_v25 = vld [vmem:[%s961_s2] sm:$0x1] }
  0x20   :  { %v819_v20 = vshrl.u32 %v109_v14, 7  ;;  %v181_v29 = vrot.slane %v802_v0, 7  ;;  %v651_v33 = vclamps-f32 %v50_v25, 1.0  ;;  %s843_s2 = sld [smem:[#allocation2 + $0x1]]  ;;  %s649_s10 = sld [smem:[#allocation2 + $0xa]]  ;;  %vm614_vm2 = vcmask 1040384  }
  0x21   :  { %v58_v3 = vsub.f32 %v802_v0, %v56_v1  ;;  %v61_v4 = vmul.f32 %v806_v2, %v806_v2  ;;  %v83_v5 = vrot.slane %v806_v2, 7  ;;  %v81_v11 = vsub.f32 %v802_v0, %v79_v10  ;;  %s642_s11 = sld [smem:[#allocation2 + $0x2]]  ;;  %s646_s12 = sld [smem:[#allocation2 + $0x6]] }
  0x22   :  { %v108_v19 = vunpack.c.0.s8 %v107_v13  ;;  %s847_s13 = sld [smem:[#allocation2 + $0xb]]  ;;  %s644_s14 = sld [smem:[#allocation2 + $0x4]] }
  0x23   :  { %v60_v6 = vmul.f32 %v58_v3, %v58_v3  ;;  %v88_v7 = vrot.slane %v58_v3, 5  ;;  %v63_v8 = vrot.slane %v61_v4, 1  ;;  %674 = vrcp.f32 %v83_v5  ;;  %s645_s15 = sld [smem:[#allocation2 + $0x5]]  ;;  %s648_s16 = sld [smem:[#allocation2 + $0x8]] }
  0x24   :  { %v827_v28 = vsub.s32 %v108_v19, %v819_v20  ;;  %v179_v32 = vstv %s814_s1  ;;  %v53_v36 = vstv %s816_s6  ;;  %s757_s17 = smov [#allocation7]  }
  0x25   :  { %676 = vrcp.f32 %v88_v7  ;;  %v65_v9 = vadd.f32 %v63_v8, %v60_v6  ;;  %v54_v40 = vmul.f32 %v651_v33, %v53_v36  ;;  %v98_v43 = vstv %s821_s7  ;;  %s631_s18 = sshll.u32 %s757_s17, 4  ;;  %s632_s18 = int_to_ptr.vmem [resolvable:$true] %s631_s18 }
  0x26   :  { %v263_v52 = vstv %s649_s10  ;;  %v101_v53 = vstv %s843_s2  ;;  %v283_v59 = vmul.f32 %v179_v32, %v802_v0  ;;  %s720_s19 = scalar_lea.vmem %s632_s18, 128  ;;  %p725_p12 = scmp.lt.s32.totalorder %s632_s18, %s632_s18 }
  0x27   :  { %678 = vrsqrt.f32 %v65_v9  ;;  %vm68_vm0 = vcmp.eq.f32.partialorder %v65_v9, inf  ;;  %v71_v22 = vand.u32 2147483648, %v65_v9  ;;  %vm70_vm1 = vcmp.eq.f32.partialorder %v65_v9, 0.0  ;;  %p721_p11 = scmp.ne.s32.totalorder %s632_s18, %s720_s19  ;;  %p726_p13 = scmp.lt.s32.totalorder %s720_s19, %s720_s19 }
  0x28   :  { %v129_v54 = vstv %s646_s12  ;;  %v154_v55 = vstv %s642_s11  ;;  %v305_v63 = vstv %s847_s13  ;;  %v220_v13 = vsub.f32 0.0, %v54_v40 }
  0x29   :  { %p727_p0 = por %p726_p13, %p725_p12 }
  0x2b   :  { %p728_p1 = pnand %p727_p0, %p721_p11 }
  0x2d   :  { %v675_v15 = vpop.eup %674 }
  0x2e   :  { %v86_v17 = vmul.f32 %v675_v15, %v81_v11 }
  0x2f   :  { %v677_v16 = vpop.eup %676 }
  0x30   :  { %v91_v18 = vmul.f32 %v677_v16, %v802_v0 }
  0x31   :  { %v679_v21 = vpop.eup %678 }
  0x32   :  { %v93_v23 = vrot.slane %v91_v18, 1  ;;  %v67_v24 = vmul.f32 %v679_v21, %v65_v9 }
  0x34   :  { %v95_v26 = vadd.f32 %v93_v23, %v86_v17  ;;  %v69_v27 = vsel %vm68_vm0, %v65_v9, %v67_v24 }
  0x35   :  { %v830_v30 = vsel %vm70_vm1, %v71_v22, %v69_v27 }
  0x36   :  { %v832_v31 = vmul.f32 0.5, %v95_v26  ;;  %680 = vrcp.f32 %v830_v30  ;;  %v112_v34 = vrot.slane %v830_v30, %v827_v28  ;;  %v180_v35 = vmul.f32 %v179_v32, %v830_v30 }
  0x37   :  { %v123_v45 = vmul.f32 %v98_v43, %v830_v30 }
  0x38   :  { %v97_v37 = vmul.f32 %v832_v31, %v832_v31  ;;  %v119_v38 = vrot.slane %v112_v34, %v827_v28  ;;  %v183_v39 = vmul.f32 %v181_v29, %v180_v35  ;;  %v157_v58 = vrot.slane %v832_v31, 1 }
  0x39   :  { %v306_v16 = vmul.f32 %v305_v63, %v832_v31  ;;  %v331_v63 = vsub.s32 0, %v819_v20 }
  0x3a   :  { %v120_v41 = vcombine.high %v119_v38, %v119_v38  ;;  %v191_v42 = vrot.slane %v183_v39, %v827_v28  ;;  %v126_v46 = vrot.slane %v97_v37, 2 }
  0x3b   :  { %v308_v33 = vcombine.high %v306_v16, %v306_v16 }
  0x3c   :  { %v849_v44 = vmul.f32 %v120_v41, %v54_v40  ;;  %v853_v47 = vrot.slane %v191_v42, %v827_v28  ;;  %v240_v49 = vmul.f32 %v126_v46, %v123_v45  ;;  %v128_v60 = vmul.f32 %v126_v46, %v830_v30 }
  0x3d   :  { %v315_v42 = vrot.slane %v308_v33, %v827_v28 }
  0x40   :  { %v681_v48 = vpop.eup %680 }
  0x41   :  { %v855_v50 = vmul.f32 %v681_v48, %v58_v3  ;;  %v76_v51 = vrot.slane %v681_v48, 7 }
  0x43   :  { %v859_v56 = vmul.f32 %v76_v51, %v806_v2  ;;  %v99_v57 = vmul.f32 %v98_v43, %v855_v50  ;;  %v241_v61 = vmul.f32 %v240_v49, %v855_v50  ;;  %v264_v62 = vmul.f32 %v263_v52, %v855_v50 }
  0x44   :  { %v124_v5 = vmul.f32 %v123_v45, %v855_v50  ;;  %v199_v49 = vcombine.high %v853_v47, %v853_v47  ;;  %v322_v52 = vrot.slane %v315_v42, %v827_v28 }
  0x45   :  { %v100_v1 = vmul.f32 %v99_v57, %v855_v50  ;;  %v130_v3 = vmul.f32 %v129_v54, %v859_v56  ;;  %v155_v2 = vmul.f32 %v154_v55, %v859_v56  ;;  %v228_v4 = vrot.slane %v859_v56, %v827_v28 }
  0x46   :  { %v242_v6 = vrot.slane %v859_v56, 1  ;;  %v272_v7 = vrot.slane %v264_v62, %v827_v28  ;;  %v284_v8 = vrot.slane %v859_v56, 2 }
  0x47   :  { %v102_v9 = vadd.f32 %v101_v53, %v100_v1  ;;  %v132_v10 = vrot.slane %v130_v3, 1  ;;  %v159_v11 = vmul.f32 %v157_v58, %v155_v2  ;;  %v229_v12 = vcombine.high %v228_v4, %v228_v4 }
  0x48   :  { %v244_v14 = vmul.f32 %v242_v6, %v241_v61  ;;  %v286_v15 = vmul.f32 %v284_v8, %v283_v59  ;;  %v279_v23 = vrot.slane %v272_v7, %v827_v28  ;;  %v326_v61 = vstv %s644_s14 }
  0x49   :  { %v103_v17 = vmul.f32 %v102_v9, %v830_v30  ;;  %v134_v18 = vadd.f32 %v132_v10, %v128_v60  ;;  %v167_v19 = vrot.slane %v159_v11, %v827_v28  ;;  %v236_v21 = vrot.slane %v229_v12, %v827_v28 }
  0x4a   :  { %v252_v22 = vrot.slane %v244_v14, %v827_v28  ;;  %v294_v24 = vrot.slane %v286_v15, %v827_v28  ;;  %v280_v38 = vcombine.high %v279_v23, %v279_v23  ;;  %v344_v6 = vstv %s645_s15 }
  0x4b   :  { %682 = vrcp.f32 %v103_v17  ;;  %v135_v25 = vmul.f32 %v134_v18, %v124_v5  ;;  %v168_v26 = vcombine.high %v167_v19, %v167_v19  ;;  %v237_v27 = vcombine.high %v236_v21, %v236_v21 }
  0x4c   :  { %v259_v29 = vrot.slane %v252_v22, %v827_v28  ;;  %v295_v32 = vcombine.high %v294_v24, %v294_v24 }
  0x4d   :  { %v143_v34 = vrot.slane %v135_v25, %v827_v28  ;;  %v175_v35 = vrot.slane %v168_v26, %v827_v28  ;;  %v239_v36 = vmul.f32 %v237_v27, %v220_v13  ;;  %v751_v26 = vmov 683565275  }
  0x4e   :  { %v260_v37 = vcombine.high %v259_v29, %v259_v29  ;;  %v302_v41 = vrot.slane %v295_v32, %v827_v28  ;;  %v752_v27 = vmov 2475754826   ;;  %v753_v32 = vmov 2131351028  }
  0x4f   :  { %v150_v39 = vrot.slane %v143_v34, %v827_v28  ;;  %v176_v45 = vcombine.high %v175_v35, %v175_v35  ;;  %v754_v34 = vmov 2102212464  }
  0x50   :  { %v262_v40 = vsub.f32 %v239_v36, %v260_v37  ;;  %v755_v36 = vmov 920167782  }
  0x51   :  { %v151_v43 = vcombine.high %v150_v39, %v150_v39 }
  0x52   :  { %v282_v46 = vsub.f32 %v262_v40, %v280_v38 }
  0x53   :  { %v153_v48 = vadd.f32 %v151_v43, %v849_v44  ;;  %v756_v43 = vmov 1326507024  }
  0x54   :  { %v304_v51 = vadd.f32 %v302_v41, %v282_v46 }
  0x55   :  { %v683_v53 = vpop.eup %682  ;;  %v178_v54 = vadd.f32 %v176_v45, %v153_v48 }
  0x56   :  { %v209_v55 = vrot.slane %v683_v53, %v827_v28  ;;  %v324_v59 = vsub.f32 %v304_v51, %v322_v52 }
  0x57   :  { %v201_v57 = vsub.f32 %v178_v54, %v199_v49 }
  0x58   :  { %v216_v58 = vrot.slane %v209_v55, %v827_v28  ;;  %v901_v28 = vstv %s648_s16 }
  0x5a   :  { %v217_v60 = vcombine.high %v216_v58, %v216_v58 }
  0x5c   :  { %v219_v62 = vmul.f32 %v217_v60, %v201_v57  ;;  %v325_v44 = vmul.f32 %v324_v59, %v217_v60 }
  0x5e   :  { %v327_v47 = vmul.f32 %v326_v61, %v219_v62  ;;  %v335_v1 = vmul.f32 %v326_v61, %v325_v44 }
  0x60   :  { %v332_v3 = vrot.slane %v327_v47, %v331_v63  ;;  %v340_v2 = vrot.slane %v335_v1, %v331_v63 }
  0x62   :  { %v334_v4 = vadd.f32 %v332_v3, %v802_v0  ;;  %v899_v5 = vadd.f32 %v340_v2, %v832_v31 }
  0x64   :  { %v343_v7 = vadd.f32 %v334_v4, %v802_v0  ;;  %v350_v8 = vadd.f32 %v899_v5, %v832_v31  ;;  %v594_v9 = vmax.f32 %v901_v28, %v334_v4 }
  0x66   :  { %v345_v20 = vmul.f32 %v344_v6, %v343_v7  ;;  %v907_v10 = vmul.f32 %v350_v8, %v344_v6  ;;  %v595_v13 = vmin.f32 %v901_v28, %v594_v9 }
  0x68   :  { %v347_v11 = vrot.slane %v345_v20, 1  ;;  %v355_v12 = vand.u32 2139095040, %v907_v10  ;;  %v352_v16 = vand.u32 2147483647, %v907_v10  ;;  %vm354_vm10 = vcmp.lt.s32.totalorder %v907_v10, 0 }
  0x6a   :  { %v912_v14 = vadd.f32 %v347_v11, %v802_v0  ;;  %v356_v15 = vshrl.u32 %v355_v12, 23  ;;  %v359_v19 = vand.u32 8388607, %v352_v16  ;;  %vm353_vm11 = vcmp.le.f32.partialorder %v352_v16, 0.7853982 }
  0x6c   :  { %v652_v17 = vadd.s32 4294967169, %v356_v15  ;;  %v916_v31 = vsel %vm614_vm2, %v912_v14, %v595_v13  ;;  %v360_v23 = vor.u32 8388608, %v359_v19  ;;  %vm444_vm2 = vweird.f32 %v907_v10 }
  0x6e   :  { %v362_v18 = vadd.s32 1, %v652_v17  ;;  %v400_v46 = vshll.u32 %v360_v23, 8 }
  0x70   :  { %vm363_vm3 = vcmp.gt.s32.totalorder %v362_v18, 0 }
  0x71   :  { %v364_v21 = vsel %vm363_vm3, %v362_v18, 0  ;;  %vm616_vm3 = vcmask 1041408  }
  0x72   :  { %v366_v22 = vand.u32 31, %v364_v21  ;;  %v365_v24 = vshrl.u32 %v364_v21, 5 }
  0x74   :  { %v367_v25 = vsub.s32 32, %v366_v22  ;;  %v369_v0 = vshll.u32 %v751_v26, %v366_v22  ;;  %v372_v29 = vshll.u32 %v752_v27, %v366_v22  ;;  %v375_v33 = vshll.u32 %v753_v32, %v366_v22 }
  0x75   :  { %v378_v35 = vshll.u32 %v754_v34, %v366_v22  ;;  %v381_v37 = vshll.u32 %v755_v36, %v366_v22  ;;  %vm384_vm4 = vcmp.lt.s32.totalorder %v365_v24, 1  ;;  %vm387_vm5 = vcmp.lt.s32.totalorder %v365_v24, 4 }
  0x76   :  { %v368_v38 = vshrl.u32 %v751_v26, %v367_v25  ;;  %v370_v39 = vshrl.u32 %v752_v27, %v367_v25  ;;  %v373_v40 = vshrl.u32 %v753_v32, %v367_v25  ;;  %v376_v41 = vshrl.u32 %v754_v34, %v367_v25 }
  0x77   :  { %v379_v42 = vshrl.u32 %v755_v36, %v367_v25  ;;  %v382_v45 = vshrl.u32 %v756_v43, %v367_v25  ;;  %vm385_vm6 = vcmp.lt.s32.totalorder %v365_v24, 2  ;;  %vm386_vm7 = vcmp.lt.s32.totalorder %v365_v24, 3 }
  0x78   :  { %v371_v48 = vor.u32 %v370_v39, %v369_v0  ;;  %v374_v49 = vor.u32 %v373_v40, %v372_v29  ;;  %v377_v51 = vor.u32 %v376_v41, %v375_v33 }
  0x79   :  { %v380_v52 = vor.u32 %v379_v42, %v378_v35  ;;  %v383_v53 = vor.u32 %v382_v45, %v381_v37 }
  0x7a   :  { %v388_v54 = vsel %vm384_vm4, %v368_v38, %v371_v48  ;;  %v389_v55 = vsel %vm387_vm5, %v377_v51, 2102212464  ;;  %v392_v57 = vsel %vm384_vm4, %v371_v48, %v374_v49  ;;  %v396_v58 = vsel %vm384_vm4, %v374_v49, %v377_v51 }
  0x7b   :  { %v390_v59 = vsel %vm386_vm7, %v374_v49, %v389_v55  ;;  %v393_v60 = vsel %vm387_vm5, %v380_v52, 920167782  ;;  %v397_v61 = vsel %vm387_vm5, %v383_v53, 1326507024  ;;  %vm618_vm4 = vcmask 1042432  }
  0x7c   :  { %v394_v62 = vsel %vm386_vm7, %v377_v51, %v393_v60  ;;  %v398_v44 = vsel %vm386_vm7, %v380_v52, %v397_v61  ;;  %v391_v63 = vsel %vm385_vm6, %v388_v54, %v390_v59  ;;  %vm620_vm5 = vcmask 1043456  }
  0x7d   :  { %v395_v47 = vsel %vm385_vm6, %v392_v57, %v394_v62  ;;  %v399_v1 = vsel %vm385_vm6, %v396_v58, %v398_v44  ;;  %v407_v7 = vmul.u32 %v400_v46, %v391_v63  ;;  %v592_v57 = vmax.f32 %v901_v28, %v899_v5 }
  0x7e   :  { %v920_v3 = vmul.u32.u64.low %v400_v46, %v399_v1  ;;  %v921_v2 = vmul.u32.u64.high %v400_v46, %v399_v1, %v920_v3  ;;  %v923_v4 = vmul.u32.u64.low %v400_v46, %v395_v47  ;;  %v924_v6 = vmul.u32.u64.high %v400_v46, %v395_v47, %v923_v4 }
  0x7f   :  { %v593_v1 = vmin.f32 %v901_v28, %v592_v57  ;;  %vm622_vm6 = vcmask 1044480  }
  0x80   :  { %vm409_vm8 = vc.u32 %v921_v2, %v923_v4  ;;  %v410_v8 = vadd.s32 1, %v924_v6  ;;  %v408_v22 = vadd.s32 %v923_v4, %v921_v2 }
  0x82   :  { %v411_v9 = vsel %vm409_vm8, %v410_v8, %v924_v6 }
  0x83   :  { %v412_v20 = vadd.s32 %v411_v9, %v407_v7  ;;  %v586_v9 = vsub.f32 0.0, %v830_v30 }
  0x85   :  { %v413_v11 = vadd.s32 536870912, %v412_v20 }
  0x87   :  { %v414_v12 = vshrl.u32 %v413_v11, 30 }
  0x89   :  { %v415_v13 = vshll.u32 %v414_v12, 30  ;;  %v438_v36 = vsub.s32 4, %v414_v12 }
  0x8b   :  { %v416_v15 = vsub.s32 %v412_v20, %v415_v13  ;;  %v439_v39 = vsel %vm354_vm10, %v438_v36, %v414_v12  ;;  %v598_v20 = vrot.slane %v593_v1, 2 }
  0x8c   :  { %v441_v42 = vsel %vm353_vm11, 0, %v439_v39 }
  0x8d   :  { %v418_v17 = vsub.s32 0, %v416_v15  ;;  %v445_v43 = vadd.s32 3, %v441_v42  ;;  %v549_v46 = vand.u32 3, %v441_v42 }
  0x8f   :  { %v653_v18 = vmin.u32 %v418_v17, %v416_v15  ;;  %v446_v45 = vand.u32 3, %v445_v43  ;;  %vm554_vm13 = vcmp.eq.s32.totalorder %v549_v46, 2  ;;  %vm551_vm15 = vcmp.eq.s32.totalorder %v549_v46, 0 }
  0x90   :  { %vm550_vm1 = vcmp.lt.s32.totalorder %v549_v46, 2 }
  0x91   :  { %v420_v19 = vclz %v653_v18  ;;  %vm451_vm12 = vcmp.eq.s32.totalorder %v446_v45, 2  ;;  %vm448_vm14 = vcmp.eq.s32.totalorder %v446_v45, 0  ;;  %vm447_vm0 = vcmp.lt.s32.totalorder %v446_v45, 2 }
  0x93   :  { %v654_v21 = vadd.s32 4294967294, %v420_v19 }
  0x95   :  { %vm655_vm9 = vcmp.lt.s32.totalorder %v654_v21, 0 }
  0x96   :  { %v423_v23 = vsel %vm655_vm9, 0, %v654_v21 }
  0x97   :  { %v424_v24 = vsub.s32 32, %v423_v23  ;;  %v425_v25 = vshll.u32 %v416_v15, %v423_v23  ;;  %v428_v26 = vsub.s32 4294967266, %v423_v23 }
  0x99   :  { %v426_v0 = vshrl.u32 %v408_v22, %v424_v24  ;;  %v429_v27 = vadd.s32 127, %v428_v26 }
  0x9b   :  { %v427_v29 = vor.u32 %v426_v0, %v425_v25  ;;  %v430_v32 = vshll.u32 %v429_v27, 23 }
  0x9d   :  { %v431_v33 = vor.u32 4788187, %v430_v32  ;;  %v434_v34 = vcvt.s32.f32 %v427_v29 }
  0x9f   :  { %v432_v35 = vand.u32 2147483647, %v431_v33 }
  0xa1   :  { %v435_v37 = vmul.f32 %v434_v34, %v432_v35 }
  0xa3   :  { %v436_v38 = vxor.u32 2147483648, %v435_v37 }
  0xa5   :  { %v437_v40 = vsel %vm354_vm10, %v436_v38, %v435_v37 }
  0xa6   :  { %v440_v41 = vsel %vm353_vm11, %v907_v10, %v437_v40 }
  0xa7   :  { %684 = vcosq.f32 %v440_v41 }
  0xa8   :  { %686 = vsinq.f32 %v440_v41 }
  0xb1   :  { %v685_v48 = vpop.eup %684 }
  0xb2   :  { %v687_v49 = vpop.eup %686  ;;  %v452_v51 = vxor.u32 2147483648, %v685_v48 }
  0xb3   :  { %v449_v16 = vxor.u32 2147483648, %v687_v49 }
  0xb4   :  { %v453_v52 = vsel %vm451_vm12, %v452_v51, %v687_v49  ;;  %v556_v53 = vsel %vm554_vm13, %v452_v51, %v687_v49 }
  0xb5   :  { %v450_v54 = vsel %vm448_vm14, %v685_v48, %v449_v16  ;;  %v553_v55 = vsel %vm551_vm15, %v685_v48, %v449_v16 }
  0xb6   :  { %v454_v58 = vsel %vm447_vm0, %v450_v54, %v453_v52  ;;  %v557_v59 = vsel %vm550_vm1, %v553_v55, %v556_v53 }
  0xb7   :  { %v455_v60 = vsel %vm444_vm2, nan, %v454_v58  ;;  %v558_v61 = vsel %vm444_vm2, nan, %v557_v59 }
  0xb8   :  { %v560_v62 = vrot.slane %v558_v61, 2  ;;  %v564_v44 = vrot.slane %v455_v60, 1  ;;  %v571_v63 = vrot.slane %v558_v61, 1  ;;  %v574_v47 = vrot.slane %v455_v60, 2 }
  0xba   :  { %v562_v3 = vmul.f32 %v560_v62, %v855_v50  ;;  %v566_v10 = vmul.f32 %v564_v44, %v859_v56  ;;  %v573_v2 = vmul.f32 %v571_v63, %v859_v56  ;;  %v576_v4 = vmul.f32 %v574_v47, %v855_v50 }
  0xbc   :  { %v568_v6 = vrot.slane %v566_v10, 1  ;;  %v578_v5 = vrot.slane %v576_v4, 7 }
  0xbe   :  { %v570_v7 = vadd.f32 %v568_v6, %v562_v3  ;;  %v580_v8 = vsub.f32 %v573_v2, %v578_v5 }
  0xc0   :  { %v581_v11 = vmul.f32 %v570_v7, %v830_v30  ;;  %v588_v12 = vrot.slane %v580_v8, 1 }
  0xc2   :  { %v583_v13 = vrot.slane %v581_v11, 2  ;;  %v590_v28 = vmul.f32 %v588_v12, %v586_v9  ;;  %v596_v15 = vmul.f32 %v588_v12, %v830_v30  ;;  %v601_v17 = vmul.f32 %v598_v20, %v581_v11 }
  0xc4   :  { %v585_v18 = vadd.f32 %v583_v13, %v912_v14  ;;  %v600_v56 = vmul.f32 %v598_v20, %v596_v15  ;;  %v606_v19 = vrot.slane %v590_v28, 7  ;;  %v612_v22 = vrot.slane %v601_v17, 5 }
  0xc6   :  { %v603_v50 = vrot.slane %v585_v18, 6  ;;  %v609_v21 = vrot.slane %v600_v56, 6 }
  0xc8   :  { %v617_v23 = vsel %vm616_vm3, %v916_v31, %v603_v50 }
  0xc9   :  { %v619_v24 = vsel %vm618_vm4, %v617_v23, %v606_v19 }
  0xca   :  { %v621_v25 = vsel %vm620_vm5, %v619_v24, %v609_v21 }
  0xcb   :  { %v623_v30 = vsel %vm622_vm6, %v621_v25, %v612_v22 }
  0xcc   :  { %624 = vst [vmem:[#allocation7] sm:$0x3f] %v623_v30 }
  0xcd   :  { %731 = shalt.err (!%p728_p1)
}
  0xce   :  { %s732_s22 = scalar_lea.hbm %s962_s3, 128 }
  0xcf   :  { %p733_p2 = scmp.ne.s32.totalorder %s962_s3, %s732_s22  ;;  %p736_p3 = scmp.lt.u32.totalorder %s732_s22, %s962_s3 }
  0xd1   :  { %p738_p4 = pnand %p736_p3, %p733_p2 }
  0xd3   :  { %741 = shalt.err (!%p738_p4)
}
  0xd4   :  { %634 = dma.vmem_to_hbm [thread:$0]  %s632_s18, 128, %s962_s3, [#allocation4]  }
  0xd5   :  { %746 = dma.done.wait [#allocation4], 128  }
  0xd6   :  { %747 = vsyncadd [#allocation4], 4294967168 }
  0xd7   :  { %638 = vsyncpa [#allocation3], 1 }
  0xd8   :  { %639 = vsyncpa [#allocation4], 1 }
  0xd9   :  { %640 = vsyncpa [#allocation5], 1 }

</bundles_post_ra>
